<compile_context>
chip_gen: v5e
topology: v5e:2x2
jax: 0.10.0
libtpu: 0.0.40
codegen_flags: <defaults>
</compile_context>

<pallas_src>
import math

import jax
import jax.numpy as jnp
from jax.experimental import pallas as pl
from jax.experimental.pallas import tpu as pltpu


def _attention_weights_kernel(zcat_ref, trig_ref, a_ref):
    """a = softmax(zcat @ trig, axis=-1).

    zcat_ref : (D1p, 2*K*K)   [z_re | z_im], rows beyond D1 zero-padded
    trig_ref : (2*K*K, C)     [cos ; sin]
    a_ref    : (D1p, C)       softmax over channels (last dim), emitted in the
                              compute dtype directly (accumulation in f32)
    """
    logits = jnp.dot(zcat_ref[...], trig_ref[...],
                     preferred_element_type=jnp.float32)
    m = jnp.max(logits, axis=-1, keepdims=True)
    e = jnp.exp(logits - m)
    a_ref[...] = (e / jnp.sum(e, axis=-1, keepdims=True)).astype(a_ref.dtype)


def _project_kernel(a_ref, x_ref, o_ref):
    """o = a @ x for one (batch, time-tile) block.

    a_ref : (D1p, C)   resident across the grid (constant index map)
    x_ref : (C, tT)    one batch element, one time tile
    o_ref : (D1p, tT)
    """
    xv = x_ref[...]
    if xv.dtype != a_ref.dtype:
        # Cast the tile in-kernel (hides under the DMA); never pre-cast X in
        # the wrapper — that would be a full extra HBM pass over X.
        xv = xv.astype(a_ref.dtype)
    o_ref[...] = jnp.dot(a_ref[...], xv,
                         preferred_element_type=jnp.float32).astype(o_ref.dtype)


def _vmem_plan():
    """(tile budget bytes, scoped vmem_limit_bytes), generation-aware."""
    phys = 64 << 20                      # conservative default = v7x per-TC VMEM
    try:
        info = pltpu.get_tpu_info()
        phys = int(getattr(info, "vmem_capacity_bytes", phys))
    except Exception:
        pass
    # Scoped-VMEM limit: leave headroom below physical, never above 96 MiB.
    # v5e/v6e (128 MiB physical) -> 96 MiB; v7x (64 MiB) -> 48 MiB.
    limit = int(min(max(phys - (16 << 20), 32 << 20), 96 << 20))
    # Keep double-buffered blocks well under the limit (compiler spill slack).
    budget = int(limit * 0.65)
    return budget, limit


def _choose_time_tile(C, D1p, T, *, x_item, a_item, out_item, vmem_budget):
    """Largest 256-aligned time tile whose per-step VMEM usage fits the budget.

    Accounts for: X block + out block (double-buffered each), the resident `a`
    block (double-buffered), the f32 accumulation intermediate, and slack for
    Mosaic internal scratch.  If T itself fits, use the full T (a full-extent
    block is always a legal BlockSpec dim, even when unaligned).
    """
    fixed = 2 * D1p * C * a_item + (1 << 20)                 # `a` + Mosaic scratch slack
    per_col = 2 * C * x_item + 2 * D1p * out_item + D1p * 4  # X + out (dbl-buf) + f32 acc
    avail = max(vmem_budget - fixed, 256 * per_col)
    cap = (avail // per_col) // 256 * 256
    cap = max(256, min(cap, 16384))
    return T if T <= cap else int(cap)


def spatial_attention_forward(z_re, z_im, cos_buf, sin_buf, X,
                              compute_dtype=None, out_dtype=None,
                              time_tile=None):
    """SpatialAttention forward.

    z_re, z_im : (D1, K, K) float32
    cos_buf    : (K, K, C)  float32
    sin_buf    : (K, K, C)  float32
    X          : (B, C, T)  any float dtype (pass bf16 to halve stage-2 DMA bytes)
    compute_dtype : optional dtype (bf16 is fine on v5e/v6e/v7x) for the
                    a @ X matmul operands; accumulation stays float32.
    out_dtype  : optional output dtype (e.g. bf16 to halve writeback bytes);
                 defaults to X.dtype.
    time_tile  : optional override of the time-tile size (testing / tuning).
    returns    : (B, D1, T) out_dtype
    """
    D1, K, _ = z_re.shape
    C = cos_buf.shape[-1]
    B, Cx, T = X.shape
    assert Cx == C
    K2 = K * K

    out_dtype = X.dtype if out_dtype is None else jnp.dtype(out_dtype)
    a_dtype = jnp.float32 if compute_dtype is None else jnp.dtype(compute_dtype)

    # ---- fold the two weight matmuls into one ------------------------------
    zcat = jnp.concatenate(
        [z_re.reshape(D1, K2), z_im.reshape(D1, K2)], axis=1)       # (D1, 2*K2)
    trig = jnp.concatenate(
        [cos_buf.reshape(K2, C), sin_buf.reshape(K2, C)], axis=0)   # (2*K2, C)

    # sublane-align the output-row dim; padded rows are sliced off at the end
    D1p = max(8, -(-D1 // 8) * 8)
    if D1p != D1:
        zcat = jnp.pad(zcat, ((0, D1p - D1), (0, 0)))

    # ---- stage 1: attention weights (runs once, off the hot path) ----------
    a = pl.pallas_call(
        _attention_weights_kernel,
        out_shape=jax.ShapeDtypeStruct((D1p, C), a_dtype),
    )(zcat.astype(jnp.float32), trig.astype(jnp.float32))

    # ---- stage 2: out[b] = a @ X[b], lane-dense time tiling ----------------
    budget, vmem_limit = _vmem_plan()
    if time_tile is not None:
        tT = min(int(time_tile), T)
    else:
        tT = _choose_time_tile(
            C, D1p, T,
            x_item=jnp.dtype(X.dtype).itemsize,
            a_item=jnp.dtype(a_dtype).itemsize,
            out_item=jnp.dtype(out_dtype).itemsize,
            vmem_budget=budget)
    nT = pl.cdiv(T, tT)

    out = pl.pallas_call(
        _project_kernel,
        out_shape=jax.ShapeDtypeStruct((B, D1p, T), out_dtype),
        grid_spec=pltpu.PrefetchScalarGridSpec(
            num_scalar_prefetch=0,
            grid=(B, nT),
            in_specs=[
                # attention weights: constant index -> stays resident in VMEM
                pl.BlockSpec((D1p, C), lambda b, t: (0, 0)),
                # X: one batch element, one time tile (no wrapper-side cast)
                pl.BlockSpec((pl.Squeezed(), C, tT), lambda b, t: (b, 0, t)),
            ],
            out_specs=pl.BlockSpec((pl.Squeezed(), D1p, tT),
                                   lambda b, t: (b, 0, t)),
        ),
        compiler_params=pltpu.CompilerParams(
            # no scratch / no cross-step state -> fully parallel grid
            dimension_semantics=("parallel", "parallel"),
            vmem_limit_bytes=vmem_limit),
    )(a, X)

    if D1p != D1:
        out = out[:, :D1, :]
    return out


def init_spatial_attention(key, loc, D1, K):
    """Deterministic parameter / buffer construction mirroring __init__."""
    C = loc.shape[0]
    x, y = loc[:, 0], loc[:, 1]

    # kaiming_uniform_(a=sqrt(5)) on a (D1, K, K) tensor: fan_in = K*K
    fan_in = K * K
    gain = math.sqrt(2.0 / (1.0 + 5.0))
    bound = gain * math.sqrt(3.0 / fan_in)
    k_re, k_im = jax.random.split(key)
    z_re = jax.random.uniform(k_re, (D1, K, K), jnp.float32, -bound, bound)
    z_im = jax.random.uniform(k_im, (D1, K, K), jnp.float32, -bound, bound)

    k_arange = jnp.arange(K, dtype=jnp.float32)
    rad1 = jnp.einsum('k,c->kc', k_arange, x)           # (K, C)
    rad2 = jnp.einsum('l,c->lc', k_arange, y)           # (K, C)
    rad = rad1[:, None, :] + rad2[None, :, :]           # (K, K, C)
    cos_buf = jnp.cos(2.0 * jnp.pi * rad)
    sin_buf = jnp.sin(2.0 * jnp.pi * rad)
    return z_re, z_im, cos_buf, sin_buf


def reference_forward(z_re, z_im, cos_buf, sin_buf, X):
    real = jnp.einsum('dkl,klc->dc', z_re, cos_buf)
    imag = jnp.einsum('dkl,klc->dc', z_im, sin_buf)
    a = jax.nn.softmax(real + imag, axis=-1)
    return jnp.einsum('oi,bit->bot', a, X)


if __name__ == "__main__":
    # Small, forward-consistent shapes.
    B, C, T = 2, 16, 16     # X: (batch, channels, time)
    D1, K = 8, 4            # output channels, spatial harmonics

    key = jax.random.PRNGKey(0)
    k_loc, k_param, k_x, k_x2 = jax.random.split(key, 4)

    loc = jax.random.uniform(k_loc, (C, 2), jnp.float32)          # sensor locations
    z_re, z_im, cos_buf, sin_buf = init_spatial_attention(k_param, loc, D1, K)
    X = jax.random.normal(k_x, (B, C, T), jnp.float32)

    # 1) default f32 path, full-T tile — strict parity with the reference
    out = spatial_attention_forward(z_re, z_im, cos_buf, sin_buf, X)
    out = jax.block_until_ready(out)
    ref = reference_forward(z_re, z_im, cos_buf, sin_buf, X)
    assert out.shape == (B, D1, T)
    assert jnp.allclose(out, ref, atol=1e-5, rtol=1e-5)

    # 2) ragged T with a forced small tile (exercises masked last-tile writeback)
    T2 = 200
    X2 = jax.random.normal(k_x2, (B, C, T2), jnp.float32)
    out2 = spatial_attention_forward(z_re, z_im, cos_buf, sin_buf, X2,
                                     time_tile=128)
    out2 = jax.block_until_ready(out2)
    ref2 = reference_forward(z_re, z_im, cos_buf, sin_buf, X2)
    assert out2.shape == (B, D1, T2)
    assert jnp.all(jnp.isfinite(out2))
    assert jnp.allclose(out2, ref2, atol=1e-5, rtol=1e-5)

    # 3) bf16 compute + bf16 writeback path (in-kernel cast of the X tile)
    out3 = spatial_attention_forward(z_re, z_im, cos_buf, sin_buf, X,
                                     compute_dtype=jnp.bfloat16,
                                     out_dtype=jnp.bfloat16)
    out3 = jax.block_until_ready(out3)
    assert out3.dtype == jnp.bfloat16
    assert jnp.allclose(out3.astype(jnp.float32), ref, atol=5e-2, rtol=5e-2)

    print("KERNEL_OK")
</pallas_src>

<mosaic_0001>
module attributes {stable_mosaic.version = 11 : i64} {
  func.func @_attention_weights_kernel(%arg0: memref<8x32xf32, #tpu.memory_space<vmem>>, %arg1: memref<32x16xf32, #tpu.memory_space<vmem>>, %arg2: memref<8x16xf32, #tpu.memory_space<vmem>>) attributes {dimension_semantics = [], scalar_prefetch = 0 : i64, scratch_operands = 0 : i64, tpu.core_type = #tpu.core_type<tc>} {
    %c0 = arith.constant 0 : index
    %c0_0 = arith.constant 0 : index
    %0 = vector.load %arg0[%c0, %c0_0] : memref<8x32xf32, #tpu.memory_space<vmem>>, vector<8x32xf32>
    %c0_1 = arith.constant 0 : index
    %c0_2 = arith.constant 0 : index
    %1 = vector.load %arg1[%c0_1, %c0_2] : memref<32x16xf32, #tpu.memory_space<vmem>>, vector<32x16xf32>
    %cst = arith.constant dense<0.000000e+00> : vector<8x16xf32>
    %2 = tpu.matmul %0, %1, %cst {dimension_numbers = #tpu.dot_dimension_numbers<[1], [0], [0], [1], [0, 0, 1, 1], [], []>} : vector<8x32xf32>, vector<32x16xf32>, vector<8x16xf32> -> vector<8x16xf32>
    %cst_3 = arith.constant dense<0xFF800000> : vector<8xf32>
    %3 = vector.multi_reduction <maximumf>, %2, %cst_3 [1] : vector<8x16xf32> to vector<8xf32>
    %4 = vector.shape_cast %3 : vector<8xf32> to vector<8x1xf32>
    %5 = vector.broadcast %4 : vector<8x1xf32> to vector<8x16xf32>
    %6 = arith.subf %2, %5 : vector<8x16xf32>
    %7 = math.exp %6 : vector<8x16xf32>
    %cst_4 = arith.constant dense<0.000000e+00> : vector<8xf32>
    %8 = vector.multi_reduction <add>, %7, %cst_4 [1] : vector<8x16xf32> to vector<8xf32>
    %9 = vector.shape_cast %8 : vector<8xf32> to vector<8x1xf32>
    %10 = vector.broadcast %9 : vector<8x1xf32> to vector<8x16xf32>
    %11 = arith.divf %7, %10 : vector<8x16xf32>
    %c0_5 = arith.constant 0 : index
    %c0_6 = arith.constant 0 : index
    %12 = vector.load %arg2[%c0_5, %c0_6] : memref<8x16xf32, #tpu.memory_space<vmem>>, vector<8x16xf32>
    tpu.vector_store %arg2[%c0_5, %c0_6], %11 {strides = array<i32>} : memref<8x16xf32, #tpu.memory_space<vmem>>, vector<8x16xf32>,
    return
  }
}

</mosaic_0001>

<bundles_post_ra>
// kernel: tpu_custom_call.1
= control target key start
LH: loop header
LB: loop body
LE: loop exit
PB: predicated region body
PF: predicated region fallthrough
CT: control target
= control target key end

     0   :  { %s152_s0 = inlined_call_operand.vmem [shape: f32[8,32], index: 0, kind: input, shape index: {}]   ;;  %s153_s1 = inlined_call_operand.vmem [shape: f32[32,16], index: 1, kind: input, shape index: {}]   ;;  %s154_s2 = inlined_call_operand.hbm [shape: f32[8,16], index: 2, kind: output, shape index: {}]  }
   0x1   :  { %v16_v0 = vld [vmem:[%s153_s1 + $0x18] sm:$0xff]  ;;  %v15_v1 = vld [vmem:[%s153_s1 + $0x10] sm:$0xff] }
   0x2   :  { %33 = vmatpush.msra.mxu0 %v16_v0 }
   0x3   :  { %7 = vsyncpa [#allocation3], 0  ;;  %v14_v2 = vld [vmem:[%s153_s1 + $0x8] sm:$0xff]  ;;  %v13_v3 = vld [vmem:[%s153_s1] sm:$0xff]  ;;  %vm17_vm0 = vcmask 261120   ;;  %vm41_vm1 = vcmask 130048  }
   0x4   :  { %34 = vmatpush.msra.mxu0 %v15_v1  ;;  %v12_v4 = vld [vmem:[%s152_s0] sm:$0xff]  ;;  %s115_s0 = smov [#allocation2]   ;;  %s74_s21 = sshll.u32 %s154_s2, 4  ;;  %s75_s21 = int_to_ptr.hbm [resolvable:$true] %s74_s21 }
   0x5   :  { %s72_s1 = sshll.u32 %s115_s0, 4  ;;  %s73_s1 = int_to_ptr.vmem [resolvable:$true] %s72_s1 }
   0x6   :  { %35 = vmatpush.msra.mxu0 %v14_v2 }
   0x8   :  { %36 = vmatpush.msra.mxu0 %v13_v3 }
   0x9   :  { %83 = vmatmul.msk.f32.vlgmr.msra.gmra.mxu0 %vm17_vm0, %v12_v4 }
  0x86   :  { %v38_v5 = vpop.f32.mrf.mxu0 }
  0x87   :  { %v42_v6 = vsel %vm41_vm1, %v38_v5, -inf }
  0x88   :  { %43 = vmax.xlane.f32.xlu0 %v42_v6 }
  0xfb   :  { %v44_v7 = vpop.xlane.xlu0 %43 }
  0xfc   :  { %v45_v8 = vsub.f32 %v38_v5, %v44_v7 }
  0xfe   :  { %v46_v9 = vmul.f32 1.442695, %v45_v8 }
 0x100   :  { %85 = vpow2.f32 %v46_v9 }
 0x106   :  { %v86_v10 = vpop.eup %85 }
 0x107   :  { %v48_v11 = vsel %vm41_vm1, %v86_v10, 0.0 }
 0x108   :  { %49 = vadd.xlane.f32.xlu0 %v48_v11 }
 0x17b   :  { %v50_v12 = vpop.xlane.xlu0 %49 }
 0x17c   :  { %87 = vrcp.f32 %v50_v12  ;;  %v62_v16 = vand.u32 2147483648, %v50_v12  ;;  %v60_v18 = vand.u32 2147483647, %v50_v12  ;;  %vm56_vm3 = vweird.f32 %v50_v12 }
 0x17e   :  { %v63_v20 = vor.u32 1.1754944e-38, %v62_v16  ;;  %vm61_vm5 = vcmp.eq.f32.partialorder %v60_v18, 8.507059e+37 }
 0x182   :  { %v88_v13 = vpop.eup %87 }
 0x183   :  { %v52_v14 = vmul.f32 %v88_v13, %v50_v12  ;;  %vm57_vm2 = vweird.f32 %v88_v13 }
 0x184   :  { %vm58_vm4 = vmor %vm56_vm3, %vm57_vm2 }
 0x185   :  { %v53_v15 = vsub.f32 1.0, %v52_v14 }
 0x187   :  { %v54_v17 = vmul.f32 %v88_v13, %v53_v15 }
 0x189   :  { %v55_v19 = vadd.f32 %v88_v13, %v54_v17 }
 0x18b   :  { %v59_v21 = vsel %vm58_vm4, %v88_v13, %v55_v19 }
 0x18c   :  { %v64_v22 = vsel %vm61_vm5, %v63_v20, %v59_v21 }
 0x18d   :  { %v65_v23 = vmul.f32 %v86_v10, %v64_v22 }
 0x18f   :  { %66 = vst.msk [vmem:[#allocation2] sm:$0xff] %vm41_vm1, %v65_v23 }
 0x190   :  { %77 = dma.vmem_to_hbm [thread:$0]  %s73_s1, 128, %s75_s21, [#allocation3]  }
 0x191   :  { %113 = dma.done.wait [#allocation3], 128  }
 0x192   :  { %114 = vsyncadd [#allocation3], 4294967168 }
 0x193   :  { %82 = vsyncpa [#allocation3], 1 }

</bundles_post_ra>
